<compile_context>
chip_gen: v5e
topology: v5e:2x2
jax: 0.10.0
libtpu: 0.0.40
codegen_flags: <defaults>
</compile_context>

<pallas_src>
import functools
import math

import jax
import jax.numpy as jnp
from jax.experimental import pallas as pl
from jax.experimental.pallas import tpu as pltpu


VMEM_LIMIT_BYTES = 64 * 1024 * 1024   # explicit scoped-VMEM cap (fits v7x's 64 MiB)
ROW_TILE_CAP = 256                    # fixed row-tile cap (multiple of 8, >= 128 rows)


# ----------------------------------------------------------------------------
# Kernel 1: shared prep — per-head K/V projection + low-rank E/F projection.
# Grid axis = heads ("parallel"); the full-x block is grid-invariant.
# ----------------------------------------------------------------------------
def kv_prep_kernel(x_ref, wk_ref, bk_ref, wv_ref, bv_ref, e_ref, f_ref,
                   pk_ref, pv_ref):
    xb = x_ref[...].astype(jnp.bfloat16)                                 # (N, C)
    k_h = jnp.dot(xb, wk_ref[0],
                  preferred_element_type=jnp.float32) + bk_ref[0]        # (N, D)
    v_h = jnp.dot(xb, wv_ref[0],
                  preferred_element_type=jnp.float32) + bv_ref[0]        # (N, D)
    pk_ref[0] = jnp.dot(e_ref[0], k_h.astype(jnp.bfloat16),
                        preferred_element_type=jnp.float32).astype(jnp.bfloat16)
    pv_ref[0] = jnp.dot(f_ref[0], v_h.astype(jnp.bfloat16),
                        preferred_element_type=jnp.float32).astype(jnp.bfloat16)


# ----------------------------------------------------------------------------
# Kernel 2: row-tiled attention tail — Q proj, softmax, attn@pV, LN + residual.
# Head selection on Wq/bq/pK/pV is a leading ref index (no lane slicing of wide
# activations); per-head results go straight into a (tile_n, H*D) scratch slab.
# ----------------------------------------------------------------------------
def node_attn_kernel(x_ref, wq_ref, bq_ref, pk_ref, pv_ref, gamma_ref, beta_ref,
                     out_ref, out_scr, *, heads, d_head, approx_recip):
    H, D = heads, d_head
    x = x_ref[...]                                   # (tile_n, C) f32 (residual)
    xb = x.astype(jnp.bfloat16)

    for h in range(H):                               # H small & static -> unrolled
        # Per-head Q projection (scale folded into Wq/bq by the wrapper).
        q_h = jnp.dot(xb, wq_ref[h],
                      preferred_element_type=jnp.float32) + bq_ref[h]    # (tile_n, D)
        # scores = q_h @ pK_h^T without materializing a transpose.
        scores = jax.lax.dot_general(
            q_h.astype(jnp.bfloat16), pk_ref[h],
            dimension_numbers=(((1,), (1,)), ((), ())),
            preferred_element_type=jnp.float32)                          # (tile_n, K)
        m = jnp.max(scores, axis=-1, keepdims=True)
        p = jnp.exp(scores - m)
        denom = jnp.sum(p, axis=-1, keepdims=True)                       # (tile_n, 1)
        o_h = jnp.dot(p.astype(jnp.bfloat16), pv_ref[h],
                      preferred_element_type=jnp.float32)                # (tile_n, D)
        inv = pl.reciprocal(denom, approx=approx_recip)                  # exact by default
        # Store this head's slice straight into the concat slab (bounds live ranges,
        # removes the jnp.concatenate over heads).
        out_scr[:, h * D:(h + 1) * D] = o_h * inv

    out = out_scr[...]                                                   # (tile_n, H*D)
    # LayerNorm (biased variance, eps=1e-5) + residual, all in f32.
    mean = jnp.mean(out, axis=-1, keepdims=True)
    var = jnp.mean((out - mean) ** 2, axis=-1, keepdims=True)
    xn = (out - mean) * jax.lax.rsqrt(var + 1e-5)
    out_ref[...] = xn * gamma_ref[...] + beta_ref[...] + x


# ----------------------------------------------------------------------------
# Kernel 3: fused edge path — Linear + LayerNorm + residual over a row tile.
# ----------------------------------------------------------------------------
def edge_kernel(ef_ref, we_ref, be_ref, gamma_ref, beta_ref, out_ref):
    ef = ef_ref[...]                                                     # (tile_ne, C)
    m = jnp.dot(ef.astype(jnp.bfloat16), we_ref[...],
                preferred_element_type=jnp.float32) + be_ref[...]        # (tile_ne, HD)
    mean = jnp.mean(m, axis=-1, keepdims=True)
    var = jnp.mean((m - mean) ** 2, axis=-1, keepdims=True)
    mn = (m - mean) * jax.lax.rsqrt(var + 1e-5)
    out_ref[...] = mn * gamma_ref[...] + beta_ref[...] + ef


# ----------------------------------------------------------------------------
# Wrapper helpers
# ----------------------------------------------------------------------------
def _row_tile(n, cap=ROW_TILE_CAP):
    """Largest divisor of n that is <= cap and a multiple of 8 (else n itself)."""
    if n <= cap:
        return n
    for t in range(cap, 7, -1):
        if n % t == 0 and t % 8 == 0:
            return t
    return n   # odd/prime n: single tile (correct, just unpipelined)


def _const_block(shape, index_map, buffered):
    # Grid-invariant block: single-buffer it (default double-buffering would waste
    # VMEM on data that never changes across grid steps).
    if buffered:
        return pl.BlockSpec(shape, index_map, pipeline_mode=pl.Buffered(1))
    return pl.BlockSpec(shape, index_map)


def _run_with_buffer_fallback(run):
    # Try with single-buffered constant blocks; fall back to default buffering if the
    # installed JAX/Mosaic does not honor pipeline_mode (functionally identical).
    try:
        return run(True)
    except Exception:
        return run(False)


# ----------------------------------------------------------------------------
# Forward
# ----------------------------------------------------------------------------
def multiheaded_forward(node_feats, edge_feats, params, *, heads, out_channels,
                        approx_recip=False):
    N, C = node_feats.shape
    Ne, _ = edge_feats.shape
    H, D = heads, out_channels
    HD = H * D
    assert C == HD, "residual add requires in_channels == heads*out_channels"

    Hk, Kdim, max_nodes = params["E"].shape
    assert Hk == H and N <= max_nodes, "need N <= max_nodes and matching head count"

    # ---- parameter prep (pure glue, once per call) ---------------------------
    def head_major(w):                       # (C, H*D) -> (H, C, D)
        return jnp.transpose(w.reshape(C, H, D), (1, 0, 2))

    scale = 1.0 / math.sqrt(D)
    wq_h = (head_major(params["wq"]) * scale).astype(jnp.bfloat16)        # (H, C, D)
    bq_h = (params["bq"].reshape(H, 1, D) * scale).astype(jnp.float32)
    wk_h = head_major(params["wk"]).astype(jnp.bfloat16)
    bk_h = params["bk"].reshape(H, 1, D).astype(jnp.float32)
    wv_h = head_major(params["wv"]).astype(jnp.bfloat16)
    bv_h = params["bv"].reshape(H, 1, D).astype(jnp.float32)
    # Pre-slice E/F to the live N columns: never DMA the max_nodes tail into VMEM.
    # (At production sizes, also pad N / D / HD up to multiples of 128 here for
    # lane-dense loads and unmasked stores; skipped at these toy shapes.)
    e_sl = params["E"][:, :, :N].astype(jnp.bfloat16)                     # (H, K, N)
    f_sl = params["F"][:, :, :N].astype(jnp.bfloat16)
    g_n = params["ln_node_gamma"].reshape(1, HD).astype(jnp.float32)
    b_n = params["ln_node_beta"].reshape(1, HD).astype(jnp.float32)

    we = params["we"].astype(jnp.bfloat16)                                # (C, HD)
    be = params["be"].reshape(1, HD).astype(jnp.float32)
    g_e = params["ln_edge_gamma"].reshape(1, HD).astype(jnp.float32)
    b_e = params["ln_edge_beta"].reshape(1, HD).astype(jnp.float32)

    # ---- advisory cost estimates ---------------------------------------------
    ce_prep = pl.CostEstimate(
        flops=H * (4 * N * C * D + 4 * Kdim * N * D),
        transcendentals=0,
        bytes_accessed=N * C * 4 + 4 * H * C * D * 2 + 4 * H * D * 4
                       + 4 * H * Kdim * N * 2 + 4 * H * Kdim * D * 2)
    ce_attn = pl.CostEstimate(
        flops=2 * N * C * HD + 4 * H * N * Kdim * D + 10 * N * HD,
        transcendentals=H * N * Kdim + N,
        bytes_accessed=N * C * 4 + N * HD * 4 + 2 * H * C * D * 2
                       + 4 * H * Kdim * D * 2 + 4 * HD * 4)
    ce_edge = pl.CostEstimate(
        flops=2 * Ne * C * HD + 10 * Ne * HD,
        transcendentals=Ne,
        bytes_accessed=Ne * C * 4 + Ne * HD * 4 + C * HD * 2 + 6 * HD * 4)

    # ---- kernel 1: shared prep (pK, pV) ---------------------------------------
    def run_prep(buffered):
        return pl.pallas_call(
            kv_prep_kernel,
            out_shape=(jax.ShapeDtypeStruct((H, Kdim, D), jnp.bfloat16),
                       jax.ShapeDtypeStruct((H, Kdim, D), jnp.bfloat16)),
            grid=(H,),
            in_specs=[
                _const_block((N, C), lambda h: (0, 0), buffered),        # full x (shared)
                pl.BlockSpec((1, C, D), lambda h: (h, 0, 0)),            # Wk_h
                pl.BlockSpec((1, 1, D), lambda h: (h, 0, 0)),            # bk_h
                pl.BlockSpec((1, C, D), lambda h: (h, 0, 0)),            # Wv_h
                pl.BlockSpec((1, 1, D), lambda h: (h, 0, 0)),            # bv_h
                pl.BlockSpec((1, Kdim, N), lambda h: (h, 0, 0)),         # E_h (pre-sliced)
                pl.BlockSpec((1, Kdim, N), lambda h: (h, 0, 0)),         # F_h (pre-sliced)
            ],
            out_specs=(pl.BlockSpec((1, Kdim, D), lambda h: (h, 0, 0)),
                       pl.BlockSpec((1, Kdim, D), lambda h: (h, 0, 0))),
            compiler_params=pltpu.CompilerParams(
                dimension_semantics=("parallel",),
                vmem_limit_bytes=VMEM_LIMIT_BYTES),
            cost_estimate=ce_prep,
        )(node_feats, wk_h, bk_h, wv_h, bv_h, e_sl, f_sl)

    pk, pv = _run_with_buffer_fallback(run_prep)

    # ---- kernel 2: row-tiled attention + LN + residual -------------------------
    tile_n = _row_tile(N)
    attn_kern = functools.partial(node_attn_kernel, heads=H, d_head=D,
                                  approx_recip=approx_recip)

    def run_attn(buffered):
        return pl.pallas_call(
            attn_kern,
            out_shape=jax.ShapeDtypeStruct((N, HD), jnp.float32),
            grid=(N // tile_n,),
            in_specs=[
                pl.BlockSpec((tile_n, C), lambda i: (i, 0)),             # row tile
                _const_block((H, C, D), lambda i: (0, 0, 0), buffered),  # Wq (pre-scaled)
                _const_block((H, 1, D), lambda i: (0, 0, 0), buffered),  # bq (pre-scaled)
                _const_block((H, Kdim, D), lambda i: (0, 0, 0), buffered),  # pK
                _const_block((H, Kdim, D), lambda i: (0, 0, 0), buffered),  # pV
                _const_block((1, HD), lambda i: (0, 0), buffered),       # LN gamma
                _const_block((1, HD), lambda i: (0, 0), buffered),       # LN beta
            ],
            out_specs=pl.BlockSpec((tile_n, HD), lambda i: (i, 0)),
            scratch_shapes=[pltpu.VMEM((tile_n, HD), jnp.float32)],      # head-concat slab
            compiler_params=pltpu.CompilerParams(
                dimension_semantics=("parallel",),
                vmem_limit_bytes=VMEM_LIMIT_BYTES),
            cost_estimate=ce_attn,
        )(node_feats, wq_h, bq_h, pk, pv, g_n, b_n)

    x = _run_with_buffer_fallback(run_attn)

    # ---- kernel 3: edge path ----------------------------------------------------
    tile_ne = _row_tile(Ne)

    def run_edge(buffered):
        return pl.pallas_call(
            edge_kernel,
            out_shape=jax.ShapeDtypeStruct((Ne, HD), jnp.float32),
            grid=(Ne // tile_ne,),
            in_specs=[
                pl.BlockSpec((tile_ne, C), lambda i: (i, 0)),
                _const_block((C, HD), lambda i: (0, 0), buffered),       # weight resident
                _const_block((1, HD), lambda i: (0, 0), buffered),
                _const_block((1, HD), lambda i: (0, 0), buffered),
                _const_block((1, HD), lambda i: (0, 0), buffered),
            ],
            out_specs=pl.BlockSpec((tile_ne, HD), lambda i: (i, 0)),
            compiler_params=pltpu.CompilerParams(
                dimension_semantics=("parallel",),
                vmem_limit_bytes=VMEM_LIMIT_BYTES),
            cost_estimate=ce_edge,
        )(edge_feats, we, be, g_e, b_e)

    y = _run_with_buffer_fallback(run_edge)
    return x, y


# ----------------------------------------------------------------------------
# Deterministic parameter construction (synthetic; shapes per module __init__).
# ----------------------------------------------------------------------------
def init_params(key, in_channels, heads, out_channels, k, max_nodes):
    HD = heads * out_channels
    ks = jax.random.split(key, 10)

    def lin_init(kw, kb, fan_in, fan_out):
        bound = 1.0 / math.sqrt(fan_in)
        w = jax.random.uniform(kw, (fan_in, fan_out), jnp.float32, -bound, bound)
        b = jax.random.uniform(kb, (fan_out,), jnp.float32, -bound, bound)
        return w, b

    wq, bq = lin_init(ks[0], ks[1], in_channels, HD)
    wk, bk = lin_init(ks[2], ks[3], in_channels, HD)
    wv, bv = lin_init(ks[4], ks[5], in_channels, HD)
    we, be = lin_init(ks[6], ks[7], in_channels, HD)

    # xavier_uniform for E, F: sqrt(6 / (fan_in + fan_out)) over the last 2 dims
    xav = math.sqrt(6.0 / (k + max_nodes))
    E = jax.random.uniform(ks[8], (heads, k, max_nodes), jnp.float32, -xav, xav)
    F = jax.random.uniform(ks[9], (heads, k, max_nodes), jnp.float32, -xav, xav)

    return {
        "wq": wq, "bq": bq, "wk": wk, "bk": bk, "wv": wv, "bv": bv,
        "we": we, "be": be, "E": E, "F": F,
        "ln_node_gamma": jnp.ones((HD,), jnp.float32),
        "ln_node_beta": jnp.zeros((HD,), jnp.float32),
        "ln_edge_gamma": jnp.ones((HD,), jnp.float32),
        "ln_edge_beta": jnp.zeros((HD,), jnp.float32),
    }


if __name__ == "__main__":
    # Small, consistent shapes: residual requires in_channels == heads*out_channels.
    heads = 2
    out_channels = 16
    in_channels = heads * out_channels   # 32
    k = 8
    max_nodes = 64
    N = 16        # number of nodes
    Ne = 16       # number of edges

    key = jax.random.PRNGKey(0)
    k_p, k_n, k_e = jax.random.split(key, 3)
    params = init_params(k_p, in_channels, heads, out_channels, k, max_nodes)
    node_feats = jax.random.normal(k_n, (N, in_channels), jnp.float32)
    edge_feats = jax.random.normal(k_e, (Ne, in_channels), jnp.float32)

    x, y = multiheaded_forward(node_feats, edge_feats, params,
                               heads=heads, out_channels=out_channels)
    jax.block_until_ready((x, y))
    assert x.shape == (N, heads * out_channels)
    assert y.shape == (Ne, heads * out_channels)
    assert bool(jnp.all(jnp.isfinite(x))) and bool(jnp.all(jnp.isfinite(y)))
    print("KERNEL_OK")
</pallas_src>

<mosaic_0001>
module attributes {stable_mosaic.version = 11 : i64} {
  func.func @kv_prep_kernel(%arg0: i32, %arg1: memref<16x32xf32, #tpu.memory_space<vmem>>, %arg2: memref<1x32x16xbf16, #tpu.memory_space<vmem>>, %arg3: memref<1x1x16xf32, #tpu.memory_space<vmem>>, %arg4: memref<1x32x16xbf16, #tpu.memory_space<vmem>>, %arg5: memref<1x1x16xf32, #tpu.memory_space<vmem>>, %arg6: memref<1x8x16xbf16, #tpu.memory_space<vmem>>, %arg7: memref<1x8x16xbf16, #tpu.memory_space<vmem>>, %arg8: memref<1x8x16xbf16, #tpu.memory_space<vmem>>, %arg9: memref<1x8x16xbf16, #tpu.memory_space<vmem>>) attributes {dimension_semantics = [#tpu.dimension_semantics<parallel>], iteration_bounds = array<i64: 2>, scalar_prefetch = 0 : i64, scratch_operands = 0 : i64, tpu.core_type = #tpu.core_type<tc>, window_params = [{pipeline_mode = #tpu.pipeline_mode<synchronous>, transform_indices = @transform_0, window_bounds = array<i64: 16, 32>}, {transform_indices = @transform_1, window_bounds = array<i64: 1, 32, 16>}, {transform_indices = @transform_2, window_bounds = array<i64: 1, 1, 16>}, {transform_indices = @transform_3, window_bounds = array<i64: 1, 32, 16>}, {transform_indices = @transform_4, window_bounds = array<i64: 1, 1, 16>}, {transform_indices = @transform_5, window_bounds = array<i64: 1, 8, 16>}, {transform_indices = @transform_6, window_bounds = array<i64: 1, 8, 16>}, {transform_indices = @transform_7, window_bounds = array<i64: 1, 8, 16>}, {transform_indices = @transform_8, window_bounds = array<i64: 1, 8, 16>}]} {
    %c0 = arith.constant 0 : index
    %c0_0 = arith.constant 0 : index
    %0 = vector.load %arg1[%c0, %c0_0] : memref<16x32xf32, #tpu.memory_space<vmem>>, vector<16x32xf32>
    %1 = arith.truncf %0 : vector<16x32xf32> to vector<16x32xbf16>
    %c0_1 = arith.constant 0 : index
    %c0_2 = arith.constant 0 : index
    %c0_3 = arith.constant 0 : index
    %2 = vector.load %arg2[%c0_1, %c0_2, %c0_3] : memref<1x32x16xbf16, #tpu.memory_space<vmem>>, vector<1x32x16xbf16>
    %3 = vector.shape_cast %2 : vector<1x32x16xbf16> to vector<32x16xbf16>
    %cst = arith.constant dense<0.000000e+00> : vector<16x16xf32>
    %4 = tpu.matmul %1, %3, %cst {dimension_numbers = #tpu.dot_dimension_numbers<[1], [0], [0], [1], [0, 0, 1, 1], [], []>} : vector<16x32xbf16>, vector<32x16xbf16>, vector<16x16xf32> -> vector<16x16xf32>
    %c0_4 = arith.constant 0 : index
    %c0_5 = arith.constant 0 : index
    %c0_6 = arith.constant 0 : index
    %5 = vector.load %arg3[%c0_4, %c0_5, %c0_6] : memref<1x1x16xf32, #tpu.memory_space<vmem>>, vector<1x1x16xf32>
    %6 = vector.shape_cast %5 : vector<1x1x16xf32> to vector<1x16xf32>
    %7 = vector.broadcast %6 : vector<1x16xf32> to vector<16x16xf32>
    %8 = arith.addf %4, %7 : vector<16x16xf32>
    %c0_7 = arith.constant 0 : index
    %c0_8 = arith.constant 0 : index
    %c0_9 = arith.constant 0 : index
    %9 = vector.load %arg4[%c0_7, %c0_8, %c0_9] : memref<1x32x16xbf16, #tpu.memory_space<vmem>>, vector<1x32x16xbf16>
    %10 = vector.shape_cast %9 : vector<1x32x16xbf16> to vector<32x16xbf16>
    %cst_10 = arith.constant dense<0.000000e+00> : vector<16x16xf32>
    %11 = tpu.matmul %1, %10, %cst_10 {dimension_numbers = #tpu.dot_dimension_numbers<[1], [0], [0], [1], [0, 0, 1, 1], [], []>} : vector<16x32xbf16>, vector<32x16xbf16>, vector<16x16xf32> -> vector<16x16xf32>
    %c0_11 = arith.constant 0 : index
    %c0_12 = arith.constant 0 : index
    %c0_13 = arith.constant 0 : index
    %12 = vector.load %arg5[%c0_11, %c0_12, %c0_13] : memref<1x1x16xf32, #tpu.memory_space<vmem>>, vector<1x1x16xf32>
    %13 = vector.shape_cast %12 : vector<1x1x16xf32> to vector<1x16xf32>
    %14 = vector.broadcast %13 : vector<1x16xf32> to vector<16x16xf32>
    %15 = arith.addf %11, %14 : vector<16x16xf32>
    %c0_14 = arith.constant 0 : index
    %c0_15 = arith.constant 0 : index
    %c0_16 = arith.constant 0 : index
    %16 = vector.load %arg6[%c0_14, %c0_15, %c0_16] : memref<1x8x16xbf16, #tpu.memory_space<vmem>>, vector<1x8x16xbf16>
    %17 = vector.shape_cast %16 : vector<1x8x16xbf16> to vector<8x16xbf16>
    %18 = arith.truncf %8 : vector<16x16xf32> to vector<16x16xbf16>
    %cst_17 = arith.constant dense<0.000000e+00> : vector<8x16xf32>
    %19 = tpu.matmul %17, %18, %cst_17 {dimension_numbers = #tpu.dot_dimension_numbers<[1], [0], [0], [1], [0, 0, 1, 1], [], []>} : vector<8x16xbf16>, vector<16x16xbf16>, vector<8x16xf32> -> vector<8x16xf32>
    %20 = arith.truncf %19 : vector<8x16xf32> to vector<8x16xbf16>
    %c0_18 = arith.constant 0 : index
    %c0_19 = arith.constant 0 : index
    %c0_20 = arith.constant 0 : index
    %21 = vector.load %arg8[%c0_18, %c0_19, %c0_20] : memref<1x8x16xbf16, #tpu.memory_space<vmem>>, vector<1x8x16xbf16>
    %22 = vector.shape_cast %21 : vector<1x8x16xbf16> to vector<8x16xbf16>
    %23 = vector.shape_cast %20 : vector<8x16xbf16> to vector<1x8x16xbf16>
    tpu.vector_store %arg8[%c0_18, %c0_19, %c0_20], %23 {strides = array<i32>} : memref<1x8x16xbf16, #tpu.memory_space<vmem>>, vector<1x8x16xbf16>,
    %c0_21 = arith.constant 0 : index
    %c0_22 = arith.constant 0 : index
    %c0_23 = arith.constant 0 : index
    %24 = vector.load %arg7[%c0_21, %c0_22, %c0_23] : memref<1x8x16xbf16, #tpu.memory_space<vmem>>, vector<1x8x16xbf16>
    %25 = vector.shape_cast %24 : vector<1x8x16xbf16> to vector<8x16xbf16>
    %26 = arith.truncf %15 : vector<16x16xf32> to vector<16x16xbf16>
    %cst_24 = arith.constant dense<0.000000e+00> : vector<8x16xf32>
    %27 = tpu.matmul %25, %26, %cst_24 {dimension_numbers = #tpu.dot_dimension_numbers<[1], [0], [0], [1], [0, 0, 1, 1], [], []>} : vector<8x16xbf16>, vector<16x16xbf16>, vector<8x16xf32> -> vector<8x16xf32>
    %28 = arith.truncf %27 : vector<8x16xf32> to vector<8x16xbf16>
    %c0_25 = arith.constant 0 : index
    %c0_26 = arith.constant 0 : index
    %c0_27 = arith.constant 0 : index
    %29 = vector.load %arg9[%c0_25, %c0_26, %c0_27] : memref<1x8x16xbf16, #tpu.memory_space<vmem>>, vector<1x8x16xbf16>
    %30 = vector.shape_cast %29 : vector<1x8x16xbf16> to vector<8x16xbf16>
    %31 = vector.shape_cast %28 : vector<8x16xbf16> to vector<1x8x16xbf16>
    tpu.vector_store %arg9[%c0_25, %c0_26, %c0_27], %31 {strides = array<i32>} : memref<1x8x16xbf16, #tpu.memory_space<vmem>>, vector<1x8x16xbf16>,
    return
  }
  func.func @transform_0(%arg0: i32) -> (i32, i32) {
    %c0_i32 = arith.constant 0 : i32
    %c0_i32_0 = arith.constant 0 : i32
    %c0_i32_1 = arith.constant 0 : i32
    return %c0_i32, %c0_i32_0 : i32, i32
  }
  func.func @transform_1(%arg0: i32) -> (i32, i32, i32) {
    %c0_i32 = arith.constant 0 : i32
    %c0_i32_0 = arith.constant 0 : i32
    %c0_i32_1 = arith.constant 0 : i32
    return %arg0, %c0_i32, %c0_i32_0 : i32, i32, i32
  }
  func.func @transform_2(%arg0: i32) -> (i32, i32, i32) {
    %c0_i32 = arith.constant 0 : i32
    %c0_i32_0 = arith.constant 0 : i32
    %c0_i32_1 = arith.constant 0 : i32
    return %arg0, %c0_i32, %c0_i32_0 : i32, i32, i32
  }
  func.func @transform_3(%arg0: i32) -> (i32, i32, i32) {
    %c0_i32 = arith.constant 0 : i32
    %c0_i32_0 = arith.constant 0 : i32
    %c0_i32_1 = arith.constant 0 : i32
    return %arg0, %c0_i32, %c0_i32_0 : i32, i32, i32
  }
  func.func @transform_4(%arg0: i32) -> (i32, i32, i32) {
    %c0_i32 = arith.constant 0 : i32
    %c0_i32_0 = arith.constant 0 : i32
    %c0_i32_1 = arith.constant 0 : i32
    return %arg0, %c0_i32, %c0_i32_0 : i32, i32, i32
  }
  func.func @transform_5(%arg0: i32) -> (i32, i32, i32) {
    %c0_i32 = arith.constant 0 : i32
    %c0_i32_0 = arith.constant 0 : i32
    %c0_i32_1 = arith.constant 0 : i32
    return %arg0, %c0_i32, %c0_i32_0 : i32, i32, i32
  }
  func.func @transform_6(%arg0: i32) -> (i32, i32, i32) {
    %c0_i32 = arith.constant 0 : i32
    %c0_i32_0 = arith.constant 0 : i32
    %c0_i32_1 = arith.constant 0 : i32
    return %arg0, %c0_i32, %c0_i32_0 : i32, i32, i32
  }
  func.func @transform_7(%arg0: i32) -> (i32, i32, i32) {
    %c0_i32 = arith.constant 0 : i32
    %c0_i32_0 = arith.constant 0 : i32
    %c0_i32_1 = arith.constant 0 : i32
    return %arg0, %c0_i32, %c0_i32_0 : i32, i32, i32
  }
  func.func @transform_8(%arg0: i32) -> (i32, i32, i32) {
    %c0_i32 = arith.constant 0 : i32
    %c0_i32_0 = arith.constant 0 : i32
    %c0_i32_1 = arith.constant 0 : i32
    return %arg0, %c0_i32, %c0_i32_0 : i32, i32, i32
  }
}

module attributes {stable_mosaic.version = 11 : i64} {
  func.func @kv_prep_kernel(%arg0: i32, %arg1: memref<16x32xf32, #tpu.memory_space<vmem>>, %arg2: memref<1x32x16xbf16, #tpu.memory_space<vmem>>, %arg3: memref<1x1x16xf32, #tpu.memory_space<vmem>>, %arg4: memref<1x32x16xbf16, #tpu.memory_space<vmem>>, %arg5: memref<1x1x16xf32, #tpu.memory_space<vmem>>, %arg6: memref<1x8x16xbf16, #tpu.memory_space<vmem>>, %arg7: memref<1x8x16xbf16, #tpu.memory_space<vmem>>, %arg8: memref<1x8x16xbf16, #tpu.memory_space<vmem>>, %arg9: memref<1x8x16xbf16, #tpu.memory_space<vmem>>) attributes {dimension_semantics = [#tpu.dimension_semantics<parallel>], iteration_bounds = array<i64: 2>, scalar_prefetch = 0 : i64, scratch_operands = 0 : i64, tpu.core_type = #tpu.core_type<tc>, window_params = [{pipeline_mode = #tpu.pipeline_mode<synchronous>, transform_indices = @transform_0, window_bounds = array<i64: 16, 32>}, {transform_indices = @transform_1, window_bounds = array<i64: 1, 32, 16>}, {transform_indices = @transform_2, window_bounds = array<i64: 1, 1, 16>}, {transform_indices = @transform_3, window_bounds = array<i64: 1, 32, 16>}, {transform_indices = @transform_4, window_bounds = array<i64: 1, 1, 16>}, {transform_indices = @transform_5, window_bounds = array<i64: 1, 8, 16>}, {transform_indices = @transform_6, window_bounds = array<i64: 1, 8, 16>}, {transform_indices = @transform_7, window_bounds = array<i64: 1, 8, 16>}, {transform_indices = @transform_8, window_bounds = array<i64: 1, 8, 16>}]} {
    %c0 = arith.constant 0 : index
    %c0_0 = arith.constant 0 : index
    %0 = vector.load %arg1[%c0, %c0_0] : memref<16x32xf32, #tpu.memory_space<vmem>>, vector<16x32xf32>
    %1 = arith.truncf %0 : vector<16x32xf32> to vector<16x32xbf16>
    %c0_1 = arith.constant 0 : index
    %c0_2 = arith.constant 0 : index
    %c0_3 = arith.constant 0 : index
    %2 = vector.load %arg2[%c0_1, %c0_2, %c0_3] : memref<1x32x16xbf16, #tpu.memory_space<vmem>>, vector<1x32x16xbf16>
    %3 = vector.shape_cast %2 : vector<1x32x16xbf16> to vector<32x16xbf16>
    %cst = arith.constant dense<0.000000e+00> : vector<16x16xf32>
    %4 = tpu.matmul %1, %3, %cst {dimension_numbers = #tpu.dot_dimension_numbers<[1], [0], [0], [1], [0, 0, 1, 1], [], []>} : vector<16x32xbf16>, vector<32x16xbf16>, vector<16x16xf32> -> vector<16x16xf32>
    %c0_4 = arith.constant 0 : index
    %c0_5 = arith.constant 0 : index
    %c0_6 = arith.constant 0 : index
    %5 = vector.load %arg3[%c0_4, %c0_5, %c0_6] : memref<1x1x16xf32, #tpu.memory_space<vmem>>, vector<1x1x16xf32>
    %6 = vector.shape_cast %5 : vector<1x1x16xf32> to vector<1x16xf32>
    %7 = vector.broadcast %6 : vector<1x16xf32> to vector<16x16xf32>
    %8 = arith.addf %4, %7 : vector<16x16xf32>
    %c0_7 = arith.constant 0 : index
    %c0_8 = arith.constant 0 : index
    %c0_9 = arith.constant 0 : index
    %9 = vector.load %arg4[%c0_7, %c0_8, %c0_9] : memref<1x32x16xbf16, #tpu.memory_space<vmem>>, vector<1x32x16xbf16>
    %10 = vector.shape_cast %9 : vector<1x32x16xbf16> to vector<32x16xbf16>
    %cst_10 = arith.constant dense<0.000000e+00> : vector<16x16xf32>
    %11 = tpu.matmul %1, %10, %cst_10 {dimension_numbers = #tpu.dot_dimension_numbers<[1], [0], [0], [1], [0, 0, 1, 1], [], []>} : vector<16x32xbf16>, vector<32x16xbf16>, vector<16x16xf32> -> vector<16x16xf32>
    %c0_11 = arith.constant 0 : index
    %c0_12 = arith.constant 0 : index
    %c0_13 = arith.constant 0 : index
    %12 = vector.load %arg5[%c0_11, %c0_12, %c0_13] : memref<1x1x16xf32, #tpu.memory_space<vmem>>, vector<1x1x16xf32>
    %13 = vector.shape_cast %12 : vector<1x1x16xf32> to vector<1x16xf32>
    %14 = vector.broadcast %13 : vector<1x16xf32> to vector<16x16xf32>
    %15 = arith.addf %11, %14 : vector<16x16xf32>
    %c0_14 = arith.constant 0 : index
    %c0_15 = arith.constant 0 : index
    %c0_16 = arith.constant 0 : index
    %16 = vector.load %arg6[%c0_14, %c0_15, %c0_16] : memref<1x8x16xbf16, #tpu.memory_space<vmem>>, vector<1x8x16xbf16>
    %17 = vector.shape_cast %16 : vector<1x8x16xbf16> to vector<8x16xbf16>
    %18 = arith.truncf %8 : vector<16x16xf32> to vector<16x16xbf16>
    %cst_17 = arith.constant dense<0.000000e+00> : vector<8x16xf32>
    %19 = tpu.matmul %17, %18, %cst_17 {dimension_numbers = #tpu.dot_dimension_numbers<[1], [0], [0], [1], [0, 0, 1, 1], [], []>} : vector<8x16xbf16>, vector<16x16xbf16>, vector<8x16xf32> -> vector<8x16xf32>
    %20 = arith.truncf %19 : vector<8x16xf32> to vector<8x16xbf16>
    %c0_18 = arith.constant 0 : index
    %c0_19 = arith.constant 0 : index
    %c0_20 = arith.constant 0 : index
    %21 = vector.load %arg8[%c0_18, %c0_19, %c0_20] : memref<1x8x16xbf16, #tpu.memory_space<vmem>>, vector<1x8x16xbf16>
    %22 = vector.shape_cast %21 : vector<1x8x16xbf16> to vector<8x16xbf16>
    %23 = vector.shape_cast %20 : vector<8x16xbf16> to vector<1x8x16xbf16>
    tpu.vector_store %arg8[%c0_18, %c0_19, %c0_20], %23 {strides = array<i32>} : memref<1x8x16xbf16, #tpu.memory_space<vmem>>, vector<1x8x16xbf16>,
    %c0_21 = arith.constant 0 : index
    %c0_22 = arith.constant 0 : index
    %c0_23 = arith.constant 0 : index
    %24 = vector.load %arg7[%c0_21, %c0_22, %c0_23] : memref<1x8x16xbf16, #tpu.memory_space<vmem>>, vector<1x8x16xbf16>
    %25 = vector.shape_cast %24 : vector<1x8x16xbf16> to vector<8x16xbf16>
    %26 = arith.truncf %15 : vector<16x16xf32> to vector<16x16xbf16>
    %cst_24 = arith.constant dense<0.000000e+00> : vector<8x16xf32>
    %27 = tpu.matmul %25, %26, %cst_24 {dimension_numbers = #tpu.dot_dimension_numbers<[1], [0], [0], [1], [0, 0, 1, 1], [], []>} : vector<8x16xbf16>, vector<16x16xbf16>, vector<8x16xf32> -> vector<8x16xf32>
    %28 = arith.truncf %27 : vector<8x16xf32> to vector<8x16xbf16>
    %c0_25 = arith.constant 0 : index
    %c0_26 = arith.constant 0 : index
    %c0_27 = arith.constant 0 : index
    %29 = vector.load %arg9[%c0_25, %c0_26, %c0_27] : memref<1x8x16xbf16, #tpu.memory_space<vmem>>, vector<1x8x16xbf16>
    %30 = vector.shape_cast %29 : vector<1x8x16xbf16> to vector<8x16xbf16>
    %31 = vector.shape_cast %28 : vector<8x16xbf16> to vector<1x8x16xbf16>
    tpu.vector_store %arg9[%c0_25, %c0_26, %c0_27], %31 {strides = array<i32>} : memref<1x8x16xbf16, #tpu.memory_space<vmem>>, vector<1x8x16xbf16>,
    return
  }
  func.func @transform_0(%arg0: i32) -> (i32, i32) {
    %c0_i32 = arith.constant 0 : i32
    %c0_i32_0 = arith.constant 0 : i32
    %c0_i32_1 = arith.constant 0 : i32
    return %c0_i32, %c0_i32_0 : i32, i32
  }
  func.func @transform_1(%arg0: i32) -> (i32, i32, i32) {
    %c0_i32 = arith.constant 0 : i32
    %c0_i32_0 = arith.constant 0 : i32
    %c0_i32_1 = arith.constant 0 : i32
    return %arg0, %c0_i32, %c0_i32_0 : i32, i32, i32
  }
  func.func @transform_2(%arg0: i32) -> (i32, i32, i32) {
    %c0_i32 = arith.constant 0 : i32
    %c0_i32_0 = arith.constant 0 : i32
    %c0_i32_1 = arith.constant 0 : i32
    return %arg0, %c0_i32, %c0_i32_0 : i32, i32, i32
  }
  func.func @transform_3(%arg0: i32) -> (i32, i32, i32) {
    %c0_i32 = arith.constant 0 : i32
    %c0_i32_0 = arith.constant 0 : i32
    %c0_i32_1 = arith.constant 0 : i32
    return %arg0, %c0_i32, %c0_i32_0 : i32, i32, i32
  }
  func.func @transform_4(%arg0: i32) -> (i32, i32, i32) {
    %c0_i32 = arith.constant 0 : i32
    %c0_i32_0 = arith.constant 0 : i32
    %c0_i32_1 = arith.constant 0 : i32
    return %arg0, %c0_i32, %c0_i32_0 : i32, i32, i32
  }
  func.func @transform_5(%arg0: i32) -> (i32, i32, i32) {
    %c0_i32 = arith.constant 0 : i32
    %c0_i32_0 = arith.constant 0 : i32
    %c0_i32_1 = arith.constant 0 : i32
    return %arg0, %c0_i32, %c0_i32_0 : i32, i32, i32
  }
  func.func @transform_6(%arg0: i32) -> (i32, i32, i32) {
    %c0_i32 = arith.constant 0 : i32
    %c0_i32_0 = arith.constant 0 : i32
    %c0_i32_1 = arith.constant 0 : i32
    return %arg0, %c0_i32, %c0_i32_0 : i32, i32, i32
  }
  func.func @transform_7(%arg0: i32) -> (i32, i32, i32) {
    %c0_i32 = arith.constant 0 : i32
    %c0_i32_0 = arith.constant 0 : i32
    %c0_i32_1 = arith.constant 0 : i32
    return %arg0, %c0_i32, %c0_i32_0 : i32, i32, i32
  }
  func.func @transform_8(%arg0: i32) -> (i32, i32, i32) {
    %c0_i32 = arith.constant 0 : i32
    %c0_i32_0 = arith.constant 0 : i32
    %c0_i32_1 = arith.constant 0 : i32
    return %arg0, %c0_i32, %c0_i32_0 : i32, i32, i32
  }
}

</mosaic_0001>

<bundles_post_ra>
// kernel: tpu_custom_call.1
= control target key start
LH: loop header
LB: loop body
LE: loop exit
PB: predicated region body
PF: predicated region fallthrough
CT: control target
= control target key end

     0   :  { %s1066_s0 = inlined_call_operand.vmem [shape: f32[16,32], index: 0, kind: input, shape index: {}]   ;;  %s1067_s1 = inlined_call_operand.vmem [shape: bf16[2,32,16], index: 1, kind: input, shape index: {}]   ;;  %s1068_s2 = inlined_call_operand.vmem [shape: f32[2,1,16], index: 2, kind: input, shape index: {}]   ;;  %s1069_s3 = inlined_call_operand.vmem [shape: bf16[2,32,16], index: 3, kind: input, shape index: {}]   ;;  %s1070_s4 = inlined_call_operand.vmem [shape: f32[2,1,16], index: 4, kind: input, shape index: {}]   ;;  %s1071_s5 = inlined_call_operand.vmem [shape: bf16[2,8,16], index: 5, kind: input, shape index: {}]   ;;  %s1072_s6 = inlined_call_operand.vmem [shape: bf16[2,8,16], index: 6, kind: input, shape index: {}]   ;;  %s1073_s7 = inlined_call_operand.hbm [shape: bf16[2,8,16], index: 7, kind: output, shape index: {0}]   ;;  %s1074_s8 = inlined_call_operand.hbm [shape: bf16[2,8,16], index: 8, kind: output, shape index: {1}]  }
   0x1   :  { %1075 = sst [smem:[#allocation8_spill]] %s1066_s0 }
   0x2   :  { %1076 = sst [smem:[#allocation9_spill]] %s1067_s1 }
   0x3   :  { %14 = vsyncpa [#allocation3], 0 }
   0x4   :  { %16 = vsyncpa [#allocation3 + $0x1], 0 }
   0x5   :  { %17 = vsyncpa [#allocation5], 0 }
   0x6   :  { %19 = vsyncpa [#allocation5 + $0x1], 0  ;;  %s927_s27 = smov 0   ;;  %s929_s28 = smov 0  }
   0x7   :  { %s931_s29 = smov 0   ;;  %s933_s30 = smov 0  }
   0x8 LB: > { %s948_s9 = sadd.s32 4294967295, %s880_s30   ;;  %s696_s10 = sadd.s32 4294967294, %s880_s30   ;;  %s880_s30 = sphi %s933_s30, %s1084_s30   ;;  %s876_s29 = sphi %s931_s29, %s1083_s29   ;;  %s872_s28 = sphi %s929_s28, %s1082_s28   ;;  %s868_s27 = sphi %s927_s27, %s1081_s27  }
   0x9   : > { %s952_s11 = sadd.s32 1, %s880_s30   ;;  %s209_s12 = sadd.s32 1, %s876_s29 }
   0xa   : > { %s206_s13 = ssub.s32 %s880_s30, %s952_s11  ;;  %p219_p0 = scmp.ne.s32.totalorder %s876_s29, %s872_s28 }
   0xb   : > { %p207_p1 = scmp.eq.s32.totalorder %s206_s13, 0  ;;  %p220_p2 = scmp.eq.s32.totalorder %s948_s9, 1 }
   0xc   : > { %p225_p3 = scmp.ne.s32.totalorder %s872_s28, %s868_s27  ;;  %p226_p4 = scmp.eq.s32.totalorder %s696_s10, 1 }
   0xd   : > { %s963_s14 = scalar_select %p207_p1, %s876_s29, %s209_s12  }
   0xe   : > { %p965_p5 = por %p220_p2, %p219_p0  ;;  %p969_p6 = por %p226_p4, %p225_p3 }
   0xf   : > { %p699_p7 = scmp.ge.s32.totalorder %s880_s30, 1  ;;  %p315_p8 = scmp.lt.s32.totalorder %s880_s30, 3 }
  0x11   : > { %p316_p9 = pnand %p699_p7, %p315_p8 }
  0x12   : > { %p373_p10 = scmp.lt.s32.totalorder (!%p316_p9), %s948_s9, 1  ;;  %s1079_s1 = sld [smem:[#allocation9_spill]] (!%p316_p9) }
  0x13   : > { %319 = sbr.rel (%p316_p9) target bundleno = 326 (0x146), region = 48  ;;  %s1080_s0 = sld [smem:[#allocation8_spill]] (!%p316_p9) }
  0x18   : > { %s977_s17 = scalar_select %p373_p10, %s948_s9, 1  ;;  %vm421_vm0 = vcmask 261120   ;;  %vm475_vm1 = vcmask 130048   ;;  %vm493_vm2 = vcmask 125952  }
  0x19   : > { %v398_v2 = vld [vmem:[%s1080_s0] sm:$0xff]  ;;  %v399_v5 = vld [vmem:[%s1080_s0 + $0x8] sm:$0xff] }
  0x1a   : > { %s734_s18 = sshll.u32 %s977_s17, 4  ;;  %s380_s21 = scalar_lea.vmem %s1068_s2, %s977_s17  ;;  %v400_v6 = vpack.c.bf16 %v399_v5, %v398_v2 }
  0x1b   : > { %s377_s24 = scalar_lea.vmem %s1079_s1, %s734_s18  ;;  %s385_s10 = scalar_lea.vmem %s1069_s3, %s734_s18  ;;  %v784_v9 = vld [vmem:[%s380_s21] ss:$0 sm:$0xff] }
  0x1c   : > { %v737_v0 = vld [vmem:[%s377_s24 + $0x8] sm:$0xff]  ;;  %v736_v3 = vld [vmem:[%s377_s24] sm:$0xff]  ;;  %s388_s25 = scalar_lea.vmem %s1070_s4, %s977_s17  ;;  %s706_s18 = sshll.u32 %s977_s17, 2 }
  0x1d   : > { %v739_v1 = vld [vmem:[%s385_s10 + $0x8] sm:$0xff]  ;;  %431 = vmatpush.bf16.msra.mxu0 %v737_v0  ;;  %v738_v4 = vld [vmem:[%s385_s10] sm:$0xff]  ;;  %s392_s10 = scalar_lea.vmem %s1071_s5, %s706_s18  ;;  %s396_s19 = scalar_lea.vmem %s1072_s6, %s706_s18 }
  0x1e   : > { %465 = vmatpush.bf16.msra.mxu1 %v739_v1  ;;  %v785_v10 = vld [vmem:[%s388_s25] ss:$0 sm:$0xff]  ;;  %s1008_s17 = sand.u32 1, %s872_s28   ;;  %s730_s21 = sshll.u32 %s948_s9, 2 }
  0x1f   : > { %v473_v19 = vld [vmem:[%s392_s10] sm:$0xf]  ;;  %s700_s20 = sshll.u32 %s1008_s17, 2  ;;  %s531_s25 = scalar_lea.hbm %s1073_s7, %s730_s21 }
  0x20   : > { %v495_v20 = vld [vmem:[%s396_s19] sm:$0xf]  ;;  %s545_s26 = scalar_lea.hbm %s1074_s8, %s730_s21  ;;  %s365_s12 = scalar_lea.vmem [#allocation2], %s700_s20 }
  0x21   : > { %432 = vmatpush.bf16.msra.mxu0 %v736_v3  ;;  %s533_s10 = sshll.u32 %s365_s12, 4  ;;  %s535_s13 = sshll.u32 %s531_s25, 4  ;;  %s534_s10 = int_to_ptr.vmem [resolvable:$true] %s533_s10  ;;  %s536_s13 = int_to_ptr.hbm [resolvable:$true] %s535_s13 }
  0x22   : > { %466 = vmatpush.bf16.msra.mxu1 %v738_v4  ;;  %s372_s19 = scalar_lea.vmem [#allocation4], %s700_s20  ;;  %s549_s1 = sshll.u32 %s545_s26, 4  ;;  %s1020_s1 = int_to_ptr.hbm [resolvable:$true] %s549_s1 }
  0x23   : > { %s547_s0 = sshll.u32 %s372_s19, 4  ;;  %s516_s9 = scalar_lea.sflag [#allocation3], %s1008_s17  ;;  %s1018_s0 = int_to_ptr.vmem [resolvable:$true] %s547_s0 }
  0x24   : > { %716 = vmatmul.msk.bf16.vlgmr.msra.gmra.mxu0 %vm421_vm0, %v400_v6  ;;  %s800_s21 = sshra.s32 %s536_s13, 4  ;;  %s806_s25 = scalar_lea.hbm %s1073_s7, 8  ;;  %s801_s21 = int_to_ptr.hbm [resolvable:$true] %s800_s21 }
  0x25   : > { %725 = vmatmul.msk.bf16.vlgmr.msra.gmra.mxu1 %vm421_vm0, %v400_v6  ;;  %s802_s20 = scalar_lea.hbm %s801_s21, 4  ;;  %p807_p0 = scmp.lt.s32.totalorder %s801_s21, %s1073_s7 }
  0x26   : > { %p803_p11 = scmp.ne.s32.totalorder %s801_s21, %s802_s20  ;;  %p808_p1 = scmp.lt.s32.totalorder %s806_s25, %s802_s20 }
  0x28   : > { %p804_p12 = pnand %p803_p11, %p965_p5  ;;  %p809_p2 = por %p808_p1, %p807_p0 }
  0x2a   : > { %p805_p13 = pneg %p804_p12 }
  0x2c   : > { %p810_p3 = pnand %p809_p2, %p805_p13 }
  0xa1   : > { %v434_v7 = vpop.f32.mrf.mxu0 }
  0xa2   : > { %v468_v8 = vpop.f32.mrf.mxu1  ;;  %v435_v13 = vadd.f32 %v784_v9, %v434_v7 }
  0xa3   : > { %v469_v14 = vadd.f32 %v785_v10, %v468_v8 }
  0xa9   : > { %v436_v11 = vpop.f32.mrf.mxu0 }
  0xaa   : > { %v470_v12 = vpop.f32.mrf.mxu1  ;;  %v437_v15 = vadd.f32 %v784_v9, %v436_v11 }
  0xab   : > { %v471_v16 = vadd.f32 %v785_v10, %v470_v12 }
  0xac   : > { %v474_v17 = vpack.c.bf16 %v437_v15, %v435_v13 }
  0xad   : > { %v496_v18 = vpack.c.bf16 %v471_v16, %v469_v14 }
  0xae   : > { %486 = vmatpush.bf16.msra.mxu2 %v474_v17 }
  0xaf   : > { %507 = vmatpush.bf16.msra.mxu3 %v496_v18 }
  0xb1   : > { %726 = vmatmul.msk.bf16.vlgmr.msra.gmra.mxu2 %vm475_vm1, %v473_v19 }
  0xb2   : > { %727 = vmatmul.msk.bf16.vlgmr.msra.gmra.mxu3 %vm475_vm1, %v495_v20 }
 0x134   : > { %v488_v21 = vpop.f32.mrf.mxu2 }
 0x135   : > { %v509_v22 = vpop.f32.mrf.mxu3  ;;  %v492_v23 = vpack.c.bf16 %v488_v21, %v488_v21 }
 0x136   : > { %v513_v24 = vpack.c.bf16 %v509_v22, %v509_v22 }
 0x137   : > { %494 = vst.msk [vmem:[%s365_s12] sm:$0xf] %vm493_vm2, %v492_v23 }
 0x138   : > { %813 = shalt.err (!%p810_p3)
}
 0x139   : > { %740 = dma.vmem_to_hbm [thread:$0]  (%p965_p5), %s534_s10, 64, %s536_s13, %s516_s9   ;;  %514 = vst.msk [vmem:[%s372_s19] sm:$0xf] %vm493_vm2, %v513_v24 }
 0x13a   : > { %s521_s26 = scalar_lea.sflag [#allocation5], %s1008_s17  ;;  %s828_s12 = sshra.s32 %s1020_s1, 4  ;;  %s829_s12 = int_to_ptr.hbm [resolvable:$true] %s828_s12 }
 0x13b   : > { %s830_s22 = scalar_lea.hbm %s829_s12, 4  ;;  %s834_s23 = scalar_lea.hbm %s1074_s8, 8 }
 0x13c   : > { %p831_p4 = scmp.ne.s32.totalorder %s829_s12, %s830_s22  ;;  %p835_p9 = scmp.lt.s32.totalorder %s829_s12, %s1074_s8 }
 0x13d   : > { %p836_p10 = scmp.lt.s32.totalorder %s834_s23, %s830_s22 }
 0x13e   : > { %p832_p7 = pnand %p831_p4, %p965_p5 }
 0x13f   : > { %p837_p11 = por %p836_p10, %p835_p9 }
 0x140   : > { %p833_p8 = pneg %p832_p7 }
 0x142   : > { %p838_p12 = pnand %p837_p11, %p833_p8 }
 0x144   : > { %841 = shalt.err (!%p838_p12)
}
 0x145   : > { %741 = dma.vmem_to_hbm [thread:$0]  (%p965_p5), %s1018_s0, 64, %s1020_s1, %s521_s26   ;;  %v490_v25 = vpop.f32.mrf.mxu2  ;;  %v511_v26 = vpop.f32.mrf.mxu3 }
 0x146 PF: > { %p751_p13 = scmp.ge.s32.totalorder %s880_s30, 2  ;;  %s561_s17 = sand.u32 1, %s868_s27  }
 0x147   : > { %s562_s10 = scalar_lea.sflag [#allocation3], %s561_s17 }
 0x148   : > { %p745_p0 = pnand %p751_p13, %p969_p6 }
 0x14a   : > { %p746_p1 = pneg %p745_p0 }
 0x14c   : > { %859 = dma.done.wait (%p746_p1), %s562_s10, 64  }
 0x14d   : > { %861 = vsyncadd (%p746_p1), %s562_s10, 4294967232  ;;  %s572_s13 = scalar_lea.sflag [#allocation5], %s561_s17 }
 0x14e   : > { %863 = dma.done.wait (%p746_p1), %s572_s13, 64  }
 0x14f   : > { %865 = vsyncadd (%p746_p1), %s572_s13, 4294967232  ;;  %p22_p5 = scmp.ge.s32.totalorder %s952_s11, 4   ;;  %s1081_s27 = smov %s872_s28 }
 0x150   : > { %s1082_s28 = smov %s876_s29  ;;  %s1083_s29 = smov %s963_s14 }
 0x151   : > { %s1084_s30 = smov %s952_s11  ;;  %24 = sbr.rel (!%p22_p5) target bundleno = 8 (0x8), region = 115 }
 0x156   :  { %578 = vsyncpa [#allocation3], 1 }
 0x157   :  { %580 = vsyncpa [#allocation3 + $0x1], 1 }
 0x158   :  { %581 = vsyncpa [#allocation5], 1 }
 0x159   :  { %583 = vsyncpa [#allocation5 + $0x1], 1 }

// kernel: tpu_custom_call.1
= control target key start
LH: loop header
LB: loop body
LE: loop exit
PB: predicated region body
PF: predicated region fallthrough
CT: control target
= control target key end

     0   :  { %s1066_s0 = inlined_call_operand.vmem [shape: f32[16,32], index: 0, kind: input, shape index: {}]   ;;  %s1067_s1 = inlined_call_operand.vmem [shape: bf16[2,32,16], index: 1, kind: input, shape index: {}]   ;;  %s1068_s2 = inlined_call_operand.vmem [shape: f32[2,1,16], index: 2, kind: input, shape index: {}]   ;;  %s1069_s3 = inlined_call_operand.vmem [shape: bf16[2,32,16], index: 3, kind: input, shape index: {}]   ;;  %s1070_s4 = inlined_call_operand.vmem [shape: f32[2,1,16], index: 4, kind: input, shape index: {}]   ;;  %s1071_s5 = inlined_call_operand.vmem [shape: bf16[2,8,16], index: 5, kind: input, shape index: {}]   ;;  %s1072_s6 = inlined_call_operand.vmem [shape: bf16[2,8,16], index: 6, kind: input, shape index: {}]   ;;  %s1073_s7 = inlined_call_operand.hbm [shape: bf16[2,8,16], index: 7, kind: output, shape index: {0}]   ;;  %s1074_s8 = inlined_call_operand.hbm [shape: bf16[2,8,16], index: 8, kind: output, shape index: {1}]  }
   0x1   :  { %1075 = sst [smem:[#allocation8_spill]] %s1066_s0 }
   0x2   :  { %1076 = sst [smem:[#allocation9_spill]] %s1067_s1 }
   0x3   :  { %14 = vsyncpa [#allocation3], 0 }
   0x4   :  { %16 = vsyncpa [#allocation3 + $0x1], 0 }
   0x5   :  { %17 = vsyncpa [#allocation5], 0 }
   0x6   :  { %19 = vsyncpa [#allocation5 + $0x1], 0  ;;  %s927_s27 = smov 0   ;;  %s929_s28 = smov 0  }
   0x7   :  { %s931_s29 = smov 0   ;;  %s933_s30 = smov 0  }
   0x8 LB: > { %s948_s9 = sadd.s32 4294967295, %s880_s30   ;;  %s696_s10 = sadd.s32 4294967294, %s880_s30   ;;  %s880_s30 = sphi %s933_s30, %s1084_s30   ;;  %s876_s29 = sphi %s931_s29, %s1083_s29   ;;  %s872_s28 = sphi %s929_s28, %s1082_s28   ;;  %s868_s27 = sphi %s927_s27, %s1081_s27  }
   0x9   : > { %s952_s11 = sadd.s32 1, %s880_s30   ;;  %s209_s12 = sadd.s32 1, %s876_s29 }
   0xa   : > { %s206_s13 = ssub.s32 %s880_s30, %s952_s11  ;;  %p219_p0 = scmp.ne.s32.totalorder %s876_s29, %s872_s28 }
   0xb   : > { %p207_p1 = scmp.eq.s32.totalorder %s206_s13, 0  ;;  %p220_p2 = scmp.eq.s32.totalorder %s948_s9, 1 }
   0xc   : > { %p225_p3 = scmp.ne.s32.totalorder %s872_s28, %s868_s27  ;;  %p226_p4 = scmp.eq.s32.totalorder %s696_s10, 1 }
   0xd   : > { %s963_s14 = scalar_select %p207_p1, %s876_s29, %s209_s12  }
   0xe   : > { %p965_p5 = por %p220_p2, %p219_p0  ;;  %p969_p6 = por %p226_p4, %p225_p3 }
   0xf   : > { %p699_p7 = scmp.ge.s32.totalorder %s880_s30, 1  ;;  %p315_p8 = scmp.lt.s32.totalorder %s880_s30, 3 }
  0x11   : > { %p316_p9 = pnand %p699_p7, %p315_p8 }
  0x12   : > { %p373_p10 = scmp.lt.s32.totalorder (!%p316_p9), %s948_s9, 1  ;;  %s1079_s1 = sld [smem:[#allocation9_spill]] (!%p316_p9) }
  0x13   : > { %319 = sbr.rel (%p316_p9) target bundleno = 326 (0x146), region = 48  ;;  %s1080_s0 = sld [smem:[#allocation8_spill]] (!%p316_p9) }
  0x18   : > { %s977_s17 = scalar_select %p373_p10, %s948_s9, 1  ;;  %vm421_vm0 = vcmask 261120   ;;  %vm475_vm1 = vcmask 130048   ;;  %vm493_vm2 = vcmask 125952  }
  0x19   : > { %v398_v2 = vld [vmem:[%s1080_s0] sm:$0xff]  ;;  %v399_v5 = vld [vmem:[%s1080_s0 + $0x8] sm:$0xff] }
  0x1a   : > { %s734_s18 = sshll.u32 %s977_s17, 4  ;;  %s380_s21 = scalar_lea.vmem %s1068_s2, %s977_s17  ;;  %v400_v6 = vpack.c.bf16 %v399_v5, %v398_v2 }
  0x1b   : > { %s377_s24 = scalar_lea.vmem %s1079_s1, %s734_s18  ;;  %s385_s10 = scalar_lea.vmem %s1069_s3, %s734_s18  ;;  %v784_v9 = vld [vmem:[%s380_s21] ss:$0 sm:$0xff] }
  0x1c   : > { %v737_v0 = vld [vmem:[%s377_s24 + $0x8] sm:$0xff]  ;;  %v736_v3 = vld [vmem:[%s377_s24] sm:$0xff]  ;;  %s388_s25 = scalar_lea.vmem %s1070_s4, %s977_s17  ;;  %s706_s18 = sshll.u32 %s977_s17, 2 }
  0x1d   : > { %v739_v1 = vld [vmem:[%s385_s10 + $0x8] sm:$0xff]  ;;  %431 = vmatpush.bf16.msra.mxu0 %v737_v0  ;;  %v738_v4 = vld [vmem:[%s385_s10] sm:$0xff]  ;;  %s392_s10 = scalar_lea.vmem %s1071_s5, %s706_s18  ;;  %s396_s19 = scalar_lea.vmem %s1072_s6, %s706_s18 }
  0x1e   : > { %465 = vmatpush.bf16.msra.mxu1 %v739_v1  ;;  %v785_v10 = vld [vmem:[%s388_s25] ss:$0 sm:$0xff]  ;;  %s1008_s17 = sand.u32 1, %s872_s28   ;;  %s730_s21 = sshll.u32 %s948_s9, 2 }
  0x1f   : > { %v473_v19 = vld [vmem:[%s392_s10] sm:$0xf]  ;;  %s700_s20 = sshll.u32 %s1008_s17, 2  ;;  %s531_s25 = scalar_lea.hbm %s1073_s7, %s730_s21 }
  0x20   : > { %v495_v20 = vld [vmem:[%s396_s19] sm:$0xf]  ;;  %s545_s26 = scalar_lea.hbm %s1074_s8, %s730_s21  ;;  %s365_s12 = scalar_lea.vmem [#allocation2], %s700_s20 }
  0x21   : > { %432 = vmatpush.bf16.msra.mxu0 %v736_v3  ;;  %s533_s10 = sshll.u32 %s365_s12, 4  ;;  %s535_s13 = sshll.u32 %s531_s25, 4  ;;  %s534_s10 = int_to_ptr.vmem [resolvable:$true] %s533_s10  ;;  %s536_s13 = int_to_ptr.hbm [resolvable:$true] %s535_s13 }
  0x22   : > { %466 = vmatpush.bf16.msra.mxu1 %v738_v4  ;;  %s372_s19 = scalar_lea.vmem [#allocation4], %s700_s20  ;;  %s549_s1 = sshll.u32 %s545_s26, 4  ;;  %s1020_s1 = int_to_ptr.hbm [resolvable:$true] %s549_s1 }
  0x23   : > { %s547_s0 = sshll.u32 %s372_s19, 4  ;;  %s516_s9 = scalar_lea.sflag [#allocation3], %s1008_s17  ;;  %s1018_s0 = int_to_ptr.vmem [resolvable:$true] %s547_s0 }
  0x24   : > { %716 = vmatmul.msk.bf16.vlgmr.msra.gmra.mxu0 %vm421_vm0, %v400_v6  ;;  %s800_s21 = sshra.s32 %s536_s13, 4  ;;  %s806_s25 = scalar_lea.hbm %s1073_s7, 8  ;;  %s801_s21 = int_to_ptr.hbm [resolvable:$true] %s800_s21 }
  0x25   : > { %725 = vmatmul.msk.bf16.vlgmr.msra.gmra.mxu1 %vm421_vm0, %v400_v6  ;;  %s802_s20 = scalar_lea.hbm %s801_s21, 4  ;;  %p807_p0 = scmp.lt.s32.totalorder %s801_s21, %s1073_s7 }
  0x26   : > { %p803_p11 = scmp.ne.s32.totalorder %s801_s21, %s802_s20  ;;  %p808_p1 = scmp.lt.s32.totalorder %s806_s25, %s802_s20 }
  0x28   : > { %p804_p12 = pnand %p803_p11, %p965_p5  ;;  %p809_p2 = por %p808_p1, %p807_p0 }
  0x2a   : > { %p805_p13 = pneg %p804_p12 }
  0x2c   : > { %p810_p3 = pnand %p809_p2, %p805_p13 }
  0xa1   : > { %v434_v7 = vpop.f32.mrf.mxu0 }
  0xa2   : > { %v468_v8 = vpop.f32.mrf.mxu1  ;;  %v435_v13 = vadd.f32 %v784_v9, %v434_v7 }
  0xa3   : > { %v469_v14 = vadd.f32 %v785_v10, %v468_v8 }
  0xa9   : > { %v436_v11 = vpop.f32.mrf.mxu0 }
  0xaa   : > { %v470_v12 = vpop.f32.mrf.mxu1  ;;  %v437_v15 = vadd.f32 %v784_v9, %v436_v11 }
  0xab   : > { %v471_v16 = vadd.f32 %v785_v10, %v470_v12 }
  0xac   : > { %v474_v17 = vpack.c.bf16 %v437_v15, %v435_v13 }
  0xad   : > { %v496_v18 = vpack.c.bf16 %v471_v16, %v469_v14 }
  0xae   : > { %486 = vmatpush.bf16.msra.mxu2 %v474_v17 }
  0xaf   : > { %507 = vmatpush.bf16.msra.mxu3 %v496_v18 }
  0xb1   : > { %726 = vmatmul.msk.bf16.vlgmr.msra.gmra.mxu2 %vm475_vm1, %v473_v19 }
  0xb2   : > { %727 = vmatmul.msk.bf16.vlgmr.msra.gmra.mxu3 %vm475_vm1, %v495_v20 }
 0x134   : > { %v488_v21 = vpop.f32.mrf.mxu2 }
 0x135   : > { %v509_v22 = vpop.f32.mrf.mxu3  ;;  %v492_v23 = vpack.c.bf16 %v488_v21, %v488_v21 }
 0x136   : > { %v513_v24 = vpack.c.bf16 %v509_v22, %v509_v22 }
 0x137   : > { %494 = vst.msk [vmem:[%s365_s12] sm:$0xf] %vm493_vm2, %v492_v23 }
 0x138   : > { %813 = shalt.err (!%p810_p3)
}
 0x139   : > { %740 = dma.vmem_to_hbm [thread:$0]  (%p965_p5), %s534_s10, 64, %s536_s13, %s516_s9   ;;  %514 = vst.msk [vmem:[%s372_s19] sm:$0xf] %vm493_vm2, %v513_v24 }
 0x13a   : > { %s521_s26 = scalar_lea.sflag [#allocation5], %s1008_s17  ;;  %s828_s12 = sshra.s32 %s1020_s1, 4  ;;  %s829_s12 = int_to_ptr.hbm [resolvable:$true] %s828_s12 }
 0x13b   : > { %s830_s22 = scalar_lea.hbm %s829_s12, 4  ;;  %s834_s23 = scalar_lea.hbm %s1074_s8, 8 }
 0x13c   : > { %p831_p4 = scmp.ne.s32.totalorder %s829_s12, %s830_s22  ;;  %p835_p9 = scmp.lt.s32.totalorder %s829_s12, %s1074_s8 }
 0x13d   : > { %p836_p10 = scmp.lt.s32.totalorder %s834_s23, %s830_s22 }
 0x13e   : > { %p832_p7 = pnand %p831_p4, %p965_p5 }
 0x13f   : > { %p837_p11 = por %p836_p10, %p835_p9 }
 0x140   : > { %p833_p8 = pneg %p832_p7 }
 0x142   : > { %p838_p12 = pnand %p837_p11, %p833_p8 }
 0x144   : > { %841 = shalt.err (!%p838_p12)
}
 0x145   : > { %741 = dma.vmem_to_hbm [thread:$0]  (%p965_p5), %s1018_s0, 64, %s1020_s1, %s521_s26   ;;  %v490_v25 = vpop.f32.mrf.mxu2  ;;  %v511_v26 = vpop.f32.mrf.mxu3 }
 0x146 PF: > { %p751_p13 = scmp.ge.s32.totalorder %s880_s30, 2  ;;  %s561_s17 = sand.u32 1, %s868_s27  }
 0x147   : > { %s562_s10 = scalar_lea.sflag [#allocation3], %s561_s17 }
 0x148   : > { %p745_p0 = pnand %p751_p13, %p969_p6 }
 0x14a   : > { %p746_p1 = pneg %p745_p0 }
 0x14c   : > { %859 = dma.done.wait (%p746_p1), %s562_s10, 64  }
 0x14d   : > { %861 = vsyncadd (%p746_p1), %s562_s10, 4294967232  ;;  %s572_s13 = scalar_lea.sflag [#allocation5], %s561_s17 }
 0x14e   : > { %863 = dma.done.wait (%p746_p1), %s572_s13, 64  }
 0x14f   : > { %865 = vsyncadd (%p746_p1), %s572_s13, 4294967232  ;;  %p22_p5 = scmp.ge.s32.totalorder %s952_s11, 4   ;;  %s1081_s27 = smov %s872_s28 }
 0x150   : > { %s1082_s28 = smov %s876_s29  ;;  %s1083_s29 = smov %s963_s14 }
 0x151   : > { %s1084_s30 = smov %s952_s11  ;;  %24 = sbr.rel (!%p22_p5) target bundleno = 8 (0x8), region = 115 }
 0x156   :  { %578 = vsyncpa [#allocation3], 1 }
 0x157   :  { %580 = vsyncpa [#allocation3 + $0x1], 1 }
 0x158   :  { %581 = vsyncpa [#allocation5], 1 }
 0x159   :  { %583 = vsyncpa [#allocation5 + $0x1], 1 }

</bundles_post_ra>
